<compile_context>
chip_gen: v5e
topology: v5e:2x2
jax: 0.10.0
libtpu: 0.0.40
codegen_flags: <defaults>
</compile_context>

<pallas_src>
import functools
import math

import jax
import jax.numpy as jnp
from jax.experimental import pallas as pl
from jax.experimental.pallas import tpu as pltpu


def _cdiv(a, b):
    return -(-a // b)


def _round_up(n, m):
    return _cdiv(n, m) * m


def _tensorcores_for_grid():
    """2 only on chips whose TensorCores Pallas can core-shard (v7x)."""
    try:
        kind = jax.devices()[0].device_kind.lower()
    except Exception:
        return 1
    return 2 if ("v7" in kind or "7x" in kind) else 1


def _make_kernel(losstype, eps, n_valid, row_tile, lane, lane_c, grid_j,
                 need_mask):
    groups = row_tile // 8          # row_tile is always a multiple of 8
    unroll = min(8, groups)

    def nonlin(d):
        # TODO(synk): on v7x, if a bundle dump shows the single EUP slot
        # binding for 'l1'/'l_log', compute sqrt/log in bf16 (f32 accumulate).
        if losstype == "l2":
            return d * d
        elif losstype == "l1":
            return jnp.sqrt(d * d + eps)
        elif losstype == "l_log":
            return -jnp.log(1.0 - jnp.abs(d) + 1e-6)
        raise ValueError("reconstruction loss type error!")

    def kernel(x_ref, t_ref, o_ref):
        c = pl.program_id(0)        # core (lane-half) index
        j = pl.program_id(1)        # row-block reduction index

        # Output block index is constant across the reduction axis j, so the
        # output block is the resident accumulator: zero it on the first step.
        @pl.when(j == 0)
        def _():
            o_ref[...] = jnp.zeros_like(o_ref)

        def body(g, acc):           # steady state: mask-free (8, lane_c) chunk
            r0 = pl.multiple_of(g * 8, 8)
            d = (x_ref[pl.ds(r0, 8), :].astype(jnp.float32)
                 - t_ref[pl.ds(r0, 8), :].astype(jnp.float32))
            return acc + nonlin(d)

        def body_masked(g, acc):    # tail block only: mask pad / OOB elements
            r0 = pl.multiple_of(g * 8, 8)
            d = (x_ref[pl.ds(r0, 8), :].astype(jnp.float32)
                 - t_ref[pl.ds(r0, 8), :].astype(jnp.float32))
            row = jax.lax.broadcasted_iota(jnp.int32, (8, lane_c), 0)
            col = jax.lax.broadcasted_iota(jnp.int32, (8, lane_c), 1)
            flat = (j * row_tile + g * 8 + row) * lane + c * lane_c + col
            m = flat < n_valid
            # Zero d before the nonlinearity so OOB garbage can't become
            # NaN/Inf inside log/sqrt, then zero the (nonzero) f(0) as well.
            return acc + jnp.where(m, nonlin(jnp.where(m, d, 0.0)), 0.0)

        def run(body_fn):
            init = jnp.zeros((8, lane_c), jnp.float32)
            return jax.lax.fori_loop(0, groups, body_fn, init, unroll=unroll)

        if need_mask:
            @pl.when(j < grid_j - 1)            # steady state
            def _():
                o_ref[...] += run(body)[None]

            @pl.when(j == grid_j - 1)           # single overhanging tail block
            def _():
                o_ref[...] += run(body_masked)[None]
        else:
            o_ref[...] += run(body)[None]

    return kernel


@functools.partial(jax.jit, static_argnames=("losstype", "eps"))
def reconstruction_loss(x, target, losstype="l2", eps=0.001):
    if losstype not in ("l2", "l1", "l_log"):
        raise ValueError("reconstruction loss type error!")
    assert x.shape == target.shape
    batch = x.shape[0]
    total = math.prod(x.shape)

    xf = x.reshape(-1)
    tf = target.reshape(-1)

    # Lane width: largest multiple of 128 such that the flattened length tiles
    # exactly into (rows, lane) with rows a multiple of 8 -> no padding.
    lane = next((c for c in (1024, 512, 256, 128) if total % (8 * c) == 0), None)
    if lane is None:
        lane = next((c for c in (1024, 512, 256, 128) if total % c == 0), 128)
    rows = _round_up(_cdiv(total, lane), 8)
    padded_len = rows * lane
    if padded_len != total:             # rare: minimal zero pad (masked in-kernel)
        xf = jnp.pad(xf, (0, padded_len - total))
        tf = jnp.pad(tf, (0, padded_len - total))
    xf = xf.reshape(rows, lane)
    tf = tf.reshape(rows, lane)

    # v7x only: split the lane dimension across the two TensorCores.
    n_cores = _tensorcores_for_grid()
    if lane // n_cores < 128:
        n_cores = 1
    lane_c = lane // n_cores

    # ~4 MiB f32 per-input block per core; snap to a divisor of rows near the
    # target so the masked tail block disappears in the common case.
    rt_target = max(8, (1 << 20) // lane_c)
    if rows <= rt_target:
        row_tile = rows
    else:
        row_tile = rt_target
        for cand in range(rt_target, rt_target // 2 - 1, -8):
            if rows % cand == 0:
                row_tile = cand
                break
    grid_j = _cdiv(rows, row_tile)
    # Every block starts in-bounds by construction -> no index clamping, and
    # no block is ever read twice.
    assert (grid_j - 1) * row_tile < rows

    # Mask code is only generated when the logical tiling overhangs the valid
    # element count (1-D pad and/or partial tail block).
    need_mask = (grid_j * row_tile * lane) != total

    kernel = _make_kernel(losstype, float(eps), total, row_tile, lane, lane_c,
                          grid_j, need_mask)

    if n_cores == 2:
        dims = (getattr(pltpu, "CORE_PARALLEL", "parallel"),
                getattr(pltpu, "ARBITRARY", "arbitrary"))
    else:
        dims = ("arbitrary", "arbitrary")

    itemsize = jnp.dtype(x.dtype).itemsize
    cost = pl.CostEstimate(
        flops=3 * total,
        transcendentals=(total if losstype in ("l1", "l_log") else 0),
        bytes_accessed=2 * padded_len * itemsize + n_cores * 8 * lane_c * 4,
    )

    partials = pl.pallas_call(
        kernel,
        out_shape=jax.ShapeDtypeStruct((n_cores, 8, lane_c), jnp.float32),
        grid=(n_cores, grid_j),
        in_specs=[
            pl.BlockSpec((row_tile, lane_c), lambda c, j: (j, c)),
            pl.BlockSpec((row_tile, lane_c), lambda c, j: (j, c)),
        ],
        out_specs=pl.BlockSpec((1, 8, lane_c), lambda c, j: (c, 0, 0)),
        compiler_params=pltpu.CompilerParams(
            dimension_semantics=dims,
            vmem_limit_bytes=32 * 1024 * 1024,
        ),
        cost_estimate=cost,
    )(xf, tf)

    # Tiny epilogue: one cross-lane reduce of the lane-parallel partials.
    # (Accumulation order differs from the reference's per-sample sums, so
    #  expect only tiny f32 rounding differences on very large tensors.)
    return jnp.sum(partials) / jnp.float32(batch)


def _reference(x, target, losstype, eps):
    d = x.astype(jnp.float32) - target.astype(jnp.float32)
    if losstype == "l2":
        per = d * d
    elif losstype == "l1":
        per = jnp.sqrt(d * d + eps)
    elif losstype == "l_log":
        per = -jnp.log(1.0 - jnp.abs(d) + 1e-6)
    return jnp.mean(jnp.sum(per, axis=(1, 2, 3)))


if __name__ == "__main__":
    key = jax.random.PRNGKey(0)
    kx, kt = jax.random.split(key)

    # Bounded inputs so |x - target| < 1 and 'l_log' stays finite (matching
    # the intended operating range of the PyTorch module).
    shapes = [(2, 4, 16, 16), (2, 3, 7, 5)]   # second exercises the pad/mask path
    ok = True
    for shape in shapes:
        x = jax.random.uniform(kx, shape, dtype=jnp.float32,
                               minval=-0.4, maxval=0.4)
        t = jax.random.uniform(kt, shape, dtype=jnp.float32,
                               minval=-0.4, maxval=0.4)
        for losstype in ("l2", "l1", "l_log"):
            out = reconstruction_loss(x, t, losstype=losstype, eps=0.001)
            out = jax.block_until_ready(out)
            ref = _reference(x, t, losstype, 0.001)
            if not jnp.allclose(out, ref, rtol=1e-4, atol=1e-4):
                ok = False
                print(f"MISMATCH shape={shape} {losstype}: "
                      f"kernel={out} ref={ref}")

    if ok:
        print("KERNEL_OK")
</pallas_src>

<mosaic_0001>
module attributes {stable_mosaic.version = 11 : i64} {
  func.func @kernel(%arg0: i32, %arg1: i32, %arg2: memref<8x256xf32, #tpu.memory_space<vmem>>, %arg3: memref<8x256xf32, #tpu.memory_space<vmem>>, %arg4: memref<1x8x256xf32, #tpu.memory_space<vmem>>) attributes {dimension_semantics = [#tpu.dimension_semantics<arbitrary>, #tpu.dimension_semantics<arbitrary>], iteration_bounds = array<i64: 1, 1>, scalar_prefetch = 0 : i64, scratch_operands = 0 : i64, tpu.core_type = #tpu.core_type<tc>, window_params = [{transform_indices = @transform_0, window_bounds = array<i64: 8, 256>}, {transform_indices = @transform_1, window_bounds = array<i64: 8, 256>}, {transform_indices = @transform_2, window_bounds = array<i64: 1, 8, 256>}]} {
    %c0_i32 = arith.constant 0 : i32
    %0 = arith.cmpi eq, %arg1, %c0_i32 : i32
    %1 = arith.extui %0 : i1 to i32
    %c0_i32_0 = arith.constant 0 : i32
    %2 = arith.cmpi ne, %1, %c0_i32_0 : i32
    scf.if %2 {
      %cst_9 = arith.constant 0.000000e+00 : f32
      %17 = vector.broadcast %cst_9 : f32 to vector<1x8x256xf32>
      %c0_10 = arith.constant 0 : index
      %c0_11 = arith.constant 0 : index
      %c0_12 = arith.constant 0 : index
      %18 = vector.load %arg4[%c0_10, %c0_11, %c0_12] : memref<1x8x256xf32, #tpu.memory_space<vmem>>, vector<1x8x256xf32>
      tpu.vector_store %arg4[%c0_10, %c0_11, %c0_12], %17 {strides = array<i32>} : memref<1x8x256xf32, #tpu.memory_space<vmem>>, vector<1x8x256xf32>,
    } else {
    }
    %c0 = arith.constant 0 : index
    %c0_1 = arith.constant 0 : index
    %c0_2 = arith.constant 0 : index
    %3 = vector.load %arg4[%c0, %c0_1, %c0_2] : memref<1x8x256xf32, #tpu.memory_space<vmem>>, vector<1x8x256xf32>
    %cst = arith.constant 0.000000e+00 : f32
    %4 = vector.broadcast %cst : f32 to vector<8x256xf32>
    %c0_i32_3 = arith.constant 0 : i32
    %c8_i32 = arith.constant 8 : i32
    %5 = arith.muli %c0_i32_3, %c8_i32 : i32
    %6 = tpu.assume_multiple %5, 8 : i32
    %7 = arith.index_cast %6 : i32 to index
    %c0_4 = arith.constant 0 : index
    %8 = vector.load %arg2[%7, %c0_4] : memref<8x256xf32, #tpu.memory_space<vmem>>, vector<8x256xf32>
    %9 = arith.index_cast %6 : i32 to index
    %c0_5 = arith.constant 0 : index
    %10 = vector.load %arg3[%9, %c0_5] : memref<8x256xf32, #tpu.memory_space<vmem>>, vector<8x256xf32>
    %11 = arith.subf %8, %10 : vector<8x256xf32>
    %12 = arith.mulf %11, %11 : vector<8x256xf32>
    %13 = arith.addf %4, %12 : vector<8x256xf32>
    %c1_i32 = arith.constant 1 : i32
    %14 = vector.shape_cast %13 : vector<8x256xf32> to vector<1x8x256xf32>
    %15 = arith.addf %3, %14 : vector<1x8x256xf32>
    %c0_6 = arith.constant 0 : index
    %c0_7 = arith.constant 0 : index
    %c0_8 = arith.constant 0 : index
    %16 = vector.load %arg4[%c0_6, %c0_7, %c0_8] : memref<1x8x256xf32, #tpu.memory_space<vmem>>, vector<1x8x256xf32>
    tpu.vector_store %arg4[%c0_6, %c0_7, %c0_8], %15 {strides = array<i32>} : memref<1x8x256xf32, #tpu.memory_space<vmem>>, vector<1x8x256xf32>,
    return
  }
  func.func @transform_0(%arg0: i32, %arg1: i32) -> (i32, i32) {
    %c0_i32 = arith.constant 0 : i32
    return %arg1, %arg0 : i32, i32
  }
  func.func @transform_1(%arg0: i32, %arg1: i32) -> (i32, i32) {
    %c0_i32 = arith.constant 0 : i32
    return %arg1, %arg0 : i32, i32
  }
  func.func @transform_2(%arg0: i32, %arg1: i32) -> (i32, i32, i32) {
    %c0_i32 = arith.constant 0 : i32
    %c0_i32_0 = arith.constant 0 : i32
    %c0_i32_1 = arith.constant 0 : i32
    return %arg0, %c0_i32, %c0_i32_0 : i32, i32, i32
  }
}

</mosaic_0001>

<bundles_post_ra>
// kernel: reconstruction_loss.1
= control target key start
LH: loop header
LB: loop body
LE: loop exit
PB: predicated region body
PF: predicated region fallthrough
CT: control target
= control target key end

     0   :  { %s76_s0 = inlined_call_operand.vmem [shape: f32[8,256], index: 0, kind: input, shape index: {}]   ;;  %s77_s1 = inlined_call_operand.vmem [shape: f32[8,256], index: 1, kind: input, shape index: {}]   ;;  %s78_s2 = inlined_call_operand.vmem [shape: f32[1,8,256], index: 2, kind: output, shape index: {}]  }
   0x1   :  { %v22_v0 = vld [vmem:[%s76_s0] sm:$0xff]  ;;  %v23_v2 = vld [vmem:[%s76_s0 + $0x8] sm:$0xff] }
   0x2   :  { %v26_v1 = vld [vmem:[%s77_s1] sm:$0xff]  ;;  %v27_v4 = vld [vmem:[%s77_s1 + $0x8] sm:$0xff] }
   0x3   :  { %v28_v3 = vsub.f32 %v22_v0, %v26_v1  ;;  %v29_v5 = vsub.f32 %v23_v2, %v27_v4 }
   0x5   :  { %v30_v6 = vmul.f32 %v28_v3, %v28_v3  ;;  %v31_v7 = vmul.f32 %v29_v5, %v29_v5 }
   0x7   :  { %36 = vst [vmem:[%s78_s2] sm:$0xff] %v30_v6 }
   0x8   :  { %37 = vst [vmem:[%s78_s2 + $0x8] sm:$0xff] %v31_v7 }

</bundles_post_ra>
